<compile_context>
chip_gen: v7x
topology: tpu7x:2x2x1
jax: 0.10.0
libtpu: 0.0.40
codegen_flags: <defaults>
</compile_context>

<pallas_src>
import jax
import jax.numpy as jnp
from jax.experimental import pallas as pl
from jax.experimental.pallas import tpu as pltpu

B          = 8     # batch (poses)
IN_DIM     = 32    # 16 joints x 2D
HID        = 128   # hidden width
OUT_DIM    = 48    # 16 joints x 3D
OUT_PAD    = 128   # lane-dense padded output width
NUM_STAGES = 2
NUM_BLOCKS = 2


def cascade_kernel(x_ref, w_in_ref, b_in_ref, w_res_ref, b_res_ref,
                   w_out_ref, b_out_ref, o_ref):
    """Single invocation: all stages unrolled, one final lane-dense store."""
    x = x_ref[...]                                   # (B, IN_DIM) bf16
    acc = jnp.zeros((x.shape[0], OUT_PAD), jnp.float32)

    for s in range(NUM_STAGES):                      # static unroll over stages
        # input projection + ReLU (f32 accumulation on the MXU)
        h = jnp.dot(x, w_in_ref[s],
                    preferred_element_type=jnp.float32) + b_in_ref[s]
        h = jnp.maximum(h, 0.0)                      # (B, HID) f32

        # residual blocks (static unroll)
        for blk in range(NUM_BLOCKS):
            y = jnp.dot(h.astype(jnp.bfloat16), w_res_ref[s, blk, 0],
                        preferred_element_type=jnp.float32) + b_res_ref[s, blk, 0]
            y = jnp.maximum(y, 0.0)
            y = jnp.dot(y.astype(jnp.bfloat16), w_res_ref[s, blk, 1],
                        preferred_element_type=jnp.float32) + b_res_ref[s, blk, 1]
            y = jnp.maximum(y, 0.0)
            h = h + y

        # output projection; cascade sum folds into the f32 accumulator
        acc = acc + jnp.dot(h.astype(jnp.bfloat16), w_out_ref[s],
                            preferred_element_type=jnp.float32) + b_out_ref[s]

    o_ref[...] = acc                                 # one unmasked 128-lane store


def cascade_forward(data, packed_params):
    w_in, b_in, w_res, b_res, w_out, b_out = packed_params
    x = data.astype(jnp.bfloat16)
    vmem = lambda: pl.BlockSpec(memory_space=pltpu.MemorySpace.VMEM)
    out_pad = pl.pallas_call(
        cascade_kernel,
        out_shape=jax.ShapeDtypeStruct((data.shape[0], OUT_PAD), jnp.float32),
        in_specs=[vmem() for _ in range(7)],
        out_specs=vmem(),
    )(x, w_in, b_in, w_res, b_res, w_out, b_out)
    return out_pad[:, :OUT_DIM]


def pack_params(params_f32):
    """bf16 weights, f32 biases, W_out/b_out zero-padded to 128 lanes."""
    w_in, b_in, w_res, b_res, w_out, b_out = params_f32
    w_out_p = jnp.zeros((NUM_STAGES, HID, OUT_PAD), jnp.float32)
    w_out_p = w_out_p.at[:, :, :OUT_DIM].set(w_out)
    b_out_p = jnp.zeros((NUM_STAGES, 1, OUT_PAD), jnp.float32)
    b_out_p = b_out_p.at[:, :, :OUT_DIM].set(b_out)
    return (w_in.astype(jnp.bfloat16), b_in,
            w_res.astype(jnp.bfloat16), b_res,
            w_out_p.astype(jnp.bfloat16), b_out_p)


def reference_forward(data, packed_params):
    """Pure-JAX reference mirroring the kernel math (same bf16 weights)."""
    w_in, b_in, w_res, b_res, w_out, b_out = packed_params
    x = data.astype(jnp.bfloat16)
    pred = jnp.zeros((data.shape[0], OUT_PAD), jnp.float32)
    for s in range(NUM_STAGES):
        h = jnp.dot(x, w_in[s], preferred_element_type=jnp.float32) + b_in[s]
        h = jnp.maximum(h, 0.0)
        for blk in range(NUM_BLOCKS):
            y = jnp.dot(h.astype(jnp.bfloat16), w_res[s, blk, 0],
                        preferred_element_type=jnp.float32) + b_res[s, blk, 0]
            y = jnp.maximum(y, 0.0)
            y = jnp.dot(y.astype(jnp.bfloat16), w_res[s, blk, 1],
                        preferred_element_type=jnp.float32) + b_res[s, blk, 1]
            y = jnp.maximum(y, 0.0)
            h = h + y
        pred = pred + jnp.dot(h.astype(jnp.bfloat16), w_out[s],
                              preferred_element_type=jnp.float32) + b_out[s]
    return pred[:, :OUT_DIM]


def init_params(key):
    ks = jax.random.split(key, 6)
    scale = 0.05
    w_in  = scale * jax.random.normal(ks[0], (NUM_STAGES, IN_DIM, HID), jnp.float32)
    b_in  = scale * jax.random.normal(ks[1], (NUM_STAGES, 1, HID), jnp.float32)
    w_res = scale * jax.random.normal(ks[2], (NUM_STAGES, NUM_BLOCKS, 2, HID, HID), jnp.float32)
    b_res = scale * jax.random.normal(ks[3], (NUM_STAGES, NUM_BLOCKS, 2, 1, HID), jnp.float32)
    w_out = scale * jax.random.normal(ks[4], (NUM_STAGES, HID, OUT_DIM), jnp.float32)
    b_out = scale * jax.random.normal(ks[5], (NUM_STAGES, 1, OUT_DIM), jnp.float32)
    return (w_in, b_in, w_res, b_res, w_out, b_out)


if __name__ == "__main__":
    key = jax.random.PRNGKey(0)
    k_data, k_param = jax.random.split(key)
    data = jax.random.normal(k_data, (B, IN_DIM), jnp.float32)
    packed = pack_params(init_params(k_param))

    out = cascade_forward(data, packed)
    out = jax.block_until_ready(out)

    ref = reference_forward(data, packed)
    assert out.shape == (B, OUT_DIM)
    assert jnp.allclose(out, ref, atol=1e-2, rtol=1e-2), "mismatch vs JAX reference"

    print("KERNEL_OK")
</pallas_src>

<mosaic_0001>
module attributes {stable_mosaic.version = 11 : i64} {
  func.func @cascade_kernel(%arg0: memref<8x32xbf16, #tpu.memory_space<vmem>>, %arg1: memref<2x32x128xbf16, #tpu.memory_space<vmem>>, %arg2: memref<2x1x128xf32, #tpu.memory_space<vmem>>, %arg3: memref<2x2x2x128x128xbf16, #tpu.memory_space<vmem>>, %arg4: memref<2x2x2x1x128xf32, #tpu.memory_space<vmem>>, %arg5: memref<2x128x128xbf16, #tpu.memory_space<vmem>>, %arg6: memref<2x1x128xf32, #tpu.memory_space<vmem>>, %arg7: memref<8x128xf32, #tpu.memory_space<vmem>>) attributes {dimension_semantics = [], scalar_prefetch = 0 : i64, scratch_operands = 0 : i64, tpu.core_type = #tpu.core_type<tc>} {
    %c0 = arith.constant 0 : index
    %c0_0 = arith.constant 0 : index
    %0 = vector.load %arg0[%c0, %c0_0] : memref<8x32xbf16, #tpu.memory_space<vmem>>, vector<8x32xbf16>
    %cst = arith.constant 0.000000e+00 : f32
    %1 = vector.broadcast %cst : f32 to vector<8x128xf32>
    %c0_1 = arith.constant 0 : index
    %c0_2 = arith.constant 0 : index
    %c0_3 = arith.constant 0 : index
    %2 = vector.load %arg1[%c0_1, %c0_2, %c0_3] : memref<2x32x128xbf16, #tpu.memory_space<vmem>>, vector<1x32x128xbf16>
    %3 = vector.shape_cast %2 : vector<1x32x128xbf16> to vector<32x128xbf16>
    %cst_4 = arith.constant dense<0.000000e+00> : vector<8x128xf32>
    %4 = tpu.matmul %0, %3, %cst_4 {dimension_numbers = #tpu.dot_dimension_numbers<[1], [0], [0], [1], [0, 0, 1, 1], [], []>} : vector<8x32xbf16>, vector<32x128xbf16>, vector<8x128xf32> -> vector<8x128xf32>
    %c0_5 = arith.constant 0 : index
    %c0_6 = arith.constant 0 : index
    %c0_7 = arith.constant 0 : index
    %5 = vector.load %arg2[%c0_5, %c0_6, %c0_7] : memref<2x1x128xf32, #tpu.memory_space<vmem>>, vector<1x1x128xf32>
    %6 = vector.shape_cast %5 : vector<1x1x128xf32> to vector<1x128xf32>
    %7 = vector.broadcast %6 : vector<1x128xf32> to vector<8x128xf32>
    %8 = arith.addf %4, %7 : vector<8x128xf32>
    %cst_8 = arith.constant 0.000000e+00 : f32
    %9 = vector.broadcast %cst_8 : f32 to vector<8x128xf32>
    %10 = arith.maximumf %8, %9 : vector<8x128xf32>
    %11 = arith.truncf %10 : vector<8x128xf32> to vector<8x128xbf16>
    %c0_9 = arith.constant 0 : index
    %c0_10 = arith.constant 0 : index
    %c0_11 = arith.constant 0 : index
    %c0_12 = arith.constant 0 : index
    %c0_13 = arith.constant 0 : index
    %12 = vector.load %arg3[%c0_9, %c0_10, %c0_11, %c0_12, %c0_13] : memref<2x2x2x128x128xbf16, #tpu.memory_space<vmem>>, vector<1x1x1x128x128xbf16>
    %13 = vector.shape_cast %12 : vector<1x1x1x128x128xbf16> to vector<128x128xbf16>
    %cst_14 = arith.constant dense<0.000000e+00> : vector<8x128xf32>
    %14 = tpu.matmul %11, %13, %cst_14 {dimension_numbers = #tpu.dot_dimension_numbers<[1], [0], [0], [1], [0, 0, 1, 1], [], []>} : vector<8x128xbf16>, vector<128x128xbf16>, vector<8x128xf32> -> vector<8x128xf32>
    %c0_15 = arith.constant 0 : index
    %c0_16 = arith.constant 0 : index
    %c0_17 = arith.constant 0 : index
    %c0_18 = arith.constant 0 : index
    %c0_19 = arith.constant 0 : index
    %15 = vector.load %arg4[%c0_15, %c0_16, %c0_17, %c0_18, %c0_19] : memref<2x2x2x1x128xf32, #tpu.memory_space<vmem>>, vector<1x1x1x1x128xf32>
    %16 = vector.shape_cast %15 : vector<1x1x1x1x128xf32> to vector<1x128xf32>
    %17 = vector.broadcast %16 : vector<1x128xf32> to vector<8x128xf32>
    %18 = arith.addf %14, %17 : vector<8x128xf32>
    %cst_20 = arith.constant 0.000000e+00 : f32
    %19 = vector.broadcast %cst_20 : f32 to vector<8x128xf32>
    %20 = arith.maximumf %18, %19 : vector<8x128xf32>
    %21 = arith.truncf %20 : vector<8x128xf32> to vector<8x128xbf16>
    %c0_21 = arith.constant 0 : index
    %c0_22 = arith.constant 0 : index
    %c1 = arith.constant 1 : index
    %c0_23 = arith.constant 0 : index
    %c0_24 = arith.constant 0 : index
    %22 = vector.load %arg3[%c0_21, %c0_22, %c1, %c0_23, %c0_24] : memref<2x2x2x128x128xbf16, #tpu.memory_space<vmem>>, vector<1x1x1x128x128xbf16>
    %23 = vector.shape_cast %22 : vector<1x1x1x128x128xbf16> to vector<128x128xbf16>
    %cst_25 = arith.constant dense<0.000000e+00> : vector<8x128xf32>
    %24 = tpu.matmul %21, %23, %cst_25 {dimension_numbers = #tpu.dot_dimension_numbers<[1], [0], [0], [1], [0, 0, 1, 1], [], []>} : vector<8x128xbf16>, vector<128x128xbf16>, vector<8x128xf32> -> vector<8x128xf32>
    %c0_26 = arith.constant 0 : index
    %c0_27 = arith.constant 0 : index
    %c1_28 = arith.constant 1 : index
    %c0_29 = arith.constant 0 : index
    %c0_30 = arith.constant 0 : index
    %25 = vector.load %arg4[%c0_26, %c0_27, %c1_28, %c0_29, %c0_30] : memref<2x2x2x1x128xf32, #tpu.memory_space<vmem>>, vector<1x1x1x1x128xf32>
    %26 = vector.shape_cast %25 : vector<1x1x1x1x128xf32> to vector<1x128xf32>
    %27 = vector.broadcast %26 : vector<1x128xf32> to vector<8x128xf32>
    %28 = arith.addf %24, %27 : vector<8x128xf32>
    %cst_31 = arith.constant 0.000000e+00 : f32
    %29 = vector.broadcast %cst_31 : f32 to vector<8x128xf32>
    %30 = arith.maximumf %28, %29 : vector<8x128xf32>
    %31 = arith.addf %10, %30 : vector<8x128xf32>
    %32 = arith.truncf %31 : vector<8x128xf32> to vector<8x128xbf16>
    %c0_32 = arith.constant 0 : index
    %c1_33 = arith.constant 1 : index
    %c0_34 = arith.constant 0 : index
    %c0_35 = arith.constant 0 : index
    %c0_36 = arith.constant 0 : index
    %33 = vector.load %arg3[%c0_32, %c1_33, %c0_34, %c0_35, %c0_36] : memref<2x2x2x128x128xbf16, #tpu.memory_space<vmem>>, vector<1x1x1x128x128xbf16>
    %34 = vector.shape_cast %33 : vector<1x1x1x128x128xbf16> to vector<128x128xbf16>
    %cst_37 = arith.constant dense<0.000000e+00> : vector<8x128xf32>
    %35 = tpu.matmul %32, %34, %cst_37 {dimension_numbers = #tpu.dot_dimension_numbers<[1], [0], [0], [1], [0, 0, 1, 1], [], []>} : vector<8x128xbf16>, vector<128x128xbf16>, vector<8x128xf32> -> vector<8x128xf32>
    %c0_38 = arith.constant 0 : index
    %c1_39 = arith.constant 1 : index
    %c0_40 = arith.constant 0 : index
    %c0_41 = arith.constant 0 : index
    %c0_42 = arith.constant 0 : index
    %36 = vector.load %arg4[%c0_38, %c1_39, %c0_40, %c0_41, %c0_42] : memref<2x2x2x1x128xf32, #tpu.memory_space<vmem>>, vector<1x1x1x1x128xf32>
    %37 = vector.shape_cast %36 : vector<1x1x1x1x128xf32> to vector<1x128xf32>
    %38 = vector.broadcast %37 : vector<1x128xf32> to vector<8x128xf32>
    %39 = arith.addf %35, %38 : vector<8x128xf32>
    %cst_43 = arith.constant 0.000000e+00 : f32
    %40 = vector.broadcast %cst_43 : f32 to vector<8x128xf32>
    %41 = arith.maximumf %39, %40 : vector<8x128xf32>
    %42 = arith.truncf %41 : vector<8x128xf32> to vector<8x128xbf16>
    %c0_44 = arith.constant 0 : index
    %c1_45 = arith.constant 1 : index
    %c1_46 = arith.constant 1 : index
    %c0_47 = arith.constant 0 : index
    %c0_48 = arith.constant 0 : index
    %43 = vector.load %arg3[%c0_44, %c1_45, %c1_46, %c0_47, %c0_48] : memref<2x2x2x128x128xbf16, #tpu.memory_space<vmem>>, vector<1x1x1x128x128xbf16>
    %44 = vector.shape_cast %43 : vector<1x1x1x128x128xbf16> to vector<128x128xbf16>
    %cst_49 = arith.constant dense<0.000000e+00> : vector<8x128xf32>
    %45 = tpu.matmul %42, %44, %cst_49 {dimension_numbers = #tpu.dot_dimension_numbers<[1], [0], [0], [1], [0, 0, 1, 1], [], []>} : vector<8x128xbf16>, vector<128x128xbf16>, vector<8x128xf32> -> vector<8x128xf32>
    %c0_50 = arith.constant 0 : index
    %c1_51 = arith.constant 1 : index
    %c1_52 = arith.constant 1 : index
    %c0_53 = arith.constant 0 : index
    %c0_54 = arith.constant 0 : index
    %46 = vector.load %arg4[%c0_50, %c1_51, %c1_52, %c0_53, %c0_54] : memref<2x2x2x1x128xf32, #tpu.memory_space<vmem>>, vector<1x1x1x1x128xf32>
    %47 = vector.shape_cast %46 : vector<1x1x1x1x128xf32> to vector<1x128xf32>
    %48 = vector.broadcast %47 : vector<1x128xf32> to vector<8x128xf32>
    %49 = arith.addf %45, %48 : vector<8x128xf32>
    %cst_55 = arith.constant 0.000000e+00 : f32
    %50 = vector.broadcast %cst_55 : f32 to vector<8x128xf32>
    %51 = arith.maximumf %49, %50 : vector<8x128xf32>
    %52 = arith.addf %31, %51 : vector<8x128xf32>
    %53 = arith.truncf %52 : vector<8x128xf32> to vector<8x128xbf16>
    %c0_56 = arith.constant 0 : index
    %c0_57 = arith.constant 0 : index
    %c0_58 = arith.constant 0 : index
    %54 = vector.load %arg5[%c0_56, %c0_57, %c0_58] : memref<2x128x128xbf16, #tpu.memory_space<vmem>>, vector<1x128x128xbf16>
    %55 = vector.shape_cast %54 : vector<1x128x128xbf16> to vector<128x128xbf16>
    %cst_59 = arith.constant dense<0.000000e+00> : vector<8x128xf32>
    %56 = tpu.matmul %53, %55, %cst_59 {dimension_numbers = #tpu.dot_dimension_numbers<[1], [0], [0], [1], [0, 0, 1, 1], [], []>} : vector<8x128xbf16>, vector<128x128xbf16>, vector<8x128xf32> -> vector<8x128xf32>
    %57 = arith.addf %1, %56 : vector<8x128xf32>
    %c0_60 = arith.constant 0 : index
    %c0_61 = arith.constant 0 : index
    %c0_62 = arith.constant 0 : index
    %58 = vector.load %arg6[%c0_60, %c0_61, %c0_62] : memref<2x1x128xf32, #tpu.memory_space<vmem>>, vector<1x1x128xf32>
    %59 = vector.shape_cast %58 : vector<1x1x128xf32> to vector<1x128xf32>
    %60 = vector.broadcast %59 : vector<1x128xf32> to vector<8x128xf32>
    %61 = arith.addf %57, %60 : vector<8x128xf32>
    %c1_63 = arith.constant 1 : index
    %c0_64 = arith.constant 0 : index
    %c0_65 = arith.constant 0 : index
    %62 = vector.load %arg1[%c1_63, %c0_64, %c0_65] : memref<2x32x128xbf16, #tpu.memory_space<vmem>>, vector<1x32x128xbf16>
    %63 = vector.shape_cast %62 : vector<1x32x128xbf16> to vector<32x128xbf16>
    %cst_66 = arith.constant dense<0.000000e+00> : vector<8x128xf32>
    %64 = tpu.matmul %0, %63, %cst_66 {dimension_numbers = #tpu.dot_dimension_numbers<[1], [0], [0], [1], [0, 0, 1, 1], [], []>} : vector<8x32xbf16>, vector<32x128xbf16>, vector<8x128xf32> -> vector<8x128xf32>
    %c1_67 = arith.constant 1 : index
    %c0_68 = arith.constant 0 : index
    %c0_69 = arith.constant 0 : index
    %65 = vector.load %arg2[%c1_67, %c0_68, %c0_69] : memref<2x1x128xf32, #tpu.memory_space<vmem>>, vector<1x1x128xf32>
    %66 = vector.shape_cast %65 : vector<1x1x128xf32> to vector<1x128xf32>
    %67 = vector.broadcast %66 : vector<1x128xf32> to vector<8x128xf32>
    %68 = arith.addf %64, %67 : vector<8x128xf32>
    %cst_70 = arith.constant 0.000000e+00 : f32
    %69 = vector.broadcast %cst_70 : f32 to vector<8x128xf32>
    %70 = arith.maximumf %68, %69 : vector<8x128xf32>
    %71 = arith.truncf %70 : vector<8x128xf32> to vector<8x128xbf16>
    %c1_71 = arith.constant 1 : index
    %c0_72 = arith.constant 0 : index
    %c0_73 = arith.constant 0 : index
    %c0_74 = arith.constant 0 : index
    %c0_75 = arith.constant 0 : index
    %72 = vector.load %arg3[%c1_71, %c0_72, %c0_73, %c0_74, %c0_75] : memref<2x2x2x128x128xbf16, #tpu.memory_space<vmem>>, vector<1x1x1x128x128xbf16>
    %73 = vector.shape_cast %72 : vector<1x1x1x128x128xbf16> to vector<128x128xbf16>
    %cst_76 = arith.constant dense<0.000000e+00> : vector<8x128xf32>
    %74 = tpu.matmul %71, %73, %cst_76 {dimension_numbers = #tpu.dot_dimension_numbers<[1], [0], [0], [1], [0, 0, 1, 1], [], []>} : vector<8x128xbf16>, vector<128x128xbf16>, vector<8x128xf32> -> vector<8x128xf32>
    %c1_77 = arith.constant 1 : index
    %c0_78 = arith.constant 0 : index
    %c0_79 = arith.constant 0 : index
    %c0_80 = arith.constant 0 : index
    %c0_81 = arith.constant 0 : index
    %75 = vector.load %arg4[%c1_77, %c0_78, %c0_79, %c0_80, %c0_81] : memref<2x2x2x1x128xf32, #tpu.memory_space<vmem>>, vector<1x1x1x1x128xf32>
    %76 = vector.shape_cast %75 : vector<1x1x1x1x128xf32> to vector<1x128xf32>
    %77 = vector.broadcast %76 : vector<1x128xf32> to vector<8x128xf32>
    %78 = arith.addf %74, %77 : vector<8x128xf32>
    %cst_82 = arith.constant 0.000000e+00 : f32
    %79 = vector.broadcast %cst_82 : f32 to vector<8x128xf32>
    %80 = arith.maximumf %78, %79 : vector<8x128xf32>
    %81 = arith.truncf %80 : vector<8x128xf32> to vector<8x128xbf16>
    %c1_83 = arith.constant 1 : index
    %c0_84 = arith.constant 0 : index
    %c1_85 = arith.constant 1 : index
    %c0_86 = arith.constant 0 : index
    %c0_87 = arith.constant 0 : index
    %82 = vector.load %arg3[%c1_83, %c0_84, %c1_85, %c0_86, %c0_87] : memref<2x2x2x128x128xbf16, #tpu.memory_space<vmem>>, vector<1x1x1x128x128xbf16>
    %83 = vector.shape_cast %82 : vector<1x1x1x128x128xbf16> to vector<128x128xbf16>
    %cst_88 = arith.constant dense<0.000000e+00> : vector<8x128xf32>
    %84 = tpu.matmul %81, %83, %cst_88 {dimension_numbers = #tpu.dot_dimension_numbers<[1], [0], [0], [1], [0, 0, 1, 1], [], []>} : vector<8x128xbf16>, vector<128x128xbf16>, vector<8x128xf32> -> vector<8x128xf32>
    %c1_89 = arith.constant 1 : index
    %c0_90 = arith.constant 0 : index
    %c1_91 = arith.constant 1 : index
    %c0_92 = arith.constant 0 : index
    %c0_93 = arith.constant 0 : index
    %85 = vector.load %arg4[%c1_89, %c0_90, %c1_91, %c0_92, %c0_93] : memref<2x2x2x1x128xf32, #tpu.memory_space<vmem>>, vector<1x1x1x1x128xf32>
    %86 = vector.shape_cast %85 : vector<1x1x1x1x128xf32> to vector<1x128xf32>
    %87 = vector.broadcast %86 : vector<1x128xf32> to vector<8x128xf32>
    %88 = arith.addf %84, %87 : vector<8x128xf32>
    %cst_94 = arith.constant 0.000000e+00 : f32
    %89 = vector.broadcast %cst_94 : f32 to vector<8x128xf32>
    %90 = arith.maximumf %88, %89 : vector<8x128xf32>
    %91 = arith.addf %70, %90 : vector<8x128xf32>
    %92 = arith.truncf %91 : vector<8x128xf32> to vector<8x128xbf16>
    %c1_95 = arith.constant 1 : index
    %c1_96 = arith.constant 1 : index
    %c0_97 = arith.constant 0 : index
    %c0_98 = arith.constant 0 : index
    %c0_99 = arith.constant 0 : index
    %93 = vector.load %arg3[%c1_95, %c1_96, %c0_97, %c0_98, %c0_99] : memref<2x2x2x128x128xbf16, #tpu.memory_space<vmem>>, vector<1x1x1x128x128xbf16>
    %94 = vector.shape_cast %93 : vector<1x1x1x128x128xbf16> to vector<128x128xbf16>
    %cst_100 = arith.constant dense<0.000000e+00> : vector<8x128xf32>
    %95 = tpu.matmul %92, %94, %cst_100 {dimension_numbers = #tpu.dot_dimension_numbers<[1], [0], [0], [1], [0, 0, 1, 1], [], []>} : vector<8x128xbf16>, vector<128x128xbf16>, vector<8x128xf32> -> vector<8x128xf32>
    %c1_101 = arith.constant 1 : index
    %c1_102 = arith.constant 1 : index
    %c0_103 = arith.constant 0 : index
    %c0_104 = arith.constant 0 : index
    %c0_105 = arith.constant 0 : index
    %96 = vector.load %arg4[%c1_101, %c1_102, %c0_103, %c0_104, %c0_105] : memref<2x2x2x1x128xf32, #tpu.memory_space<vmem>>, vector<1x1x1x1x128xf32>
    %97 = vector.shape_cast %96 : vector<1x1x1x1x128xf32> to vector<1x128xf32>
    %98 = vector.broadcast %97 : vector<1x128xf32> to vector<8x128xf32>
    %99 = arith.addf %95, %98 : vector<8x128xf32>
    %cst_106 = arith.constant 0.000000e+00 : f32
    %100 = vector.broadcast %cst_106 : f32 to vector<8x128xf32>
    %101 = arith.maximumf %99, %100 : vector<8x128xf32>
    %102 = arith.truncf %101 : vector<8x128xf32> to vector<8x128xbf16>
    %c1_107 = arith.constant 1 : index
    %c1_108 = arith.constant 1 : index
    %c1_109 = arith.constant 1 : index
    %c0_110 = arith.constant 0 : index
    %c0_111 = arith.constant 0 : index
    %103 = vector.load %arg3[%c1_107, %c1_108, %c1_109, %c0_110, %c0_111] : memref<2x2x2x128x128xbf16, #tpu.memory_space<vmem>>, vector<1x1x1x128x128xbf16>
    %104 = vector.shape_cast %103 : vector<1x1x1x128x128xbf16> to vector<128x128xbf16>
    %cst_112 = arith.constant dense<0.000000e+00> : vector<8x128xf32>
    %105 = tpu.matmul %102, %104, %cst_112 {dimension_numbers = #tpu.dot_dimension_numbers<[1], [0], [0], [1], [0, 0, 1, 1], [], []>} : vector<8x128xbf16>, vector<128x128xbf16>, vector<8x128xf32> -> vector<8x128xf32>
    %c1_113 = arith.constant 1 : index
    %c1_114 = arith.constant 1 : index
    %c1_115 = arith.constant 1 : index
    %c0_116 = arith.constant 0 : index
    %c0_117 = arith.constant 0 : index
    %106 = vector.load %arg4[%c1_113, %c1_114, %c1_115, %c0_116, %c0_117] : memref<2x2x2x1x128xf32, #tpu.memory_space<vmem>>, vector<1x1x1x1x128xf32>
    %107 = vector.shape_cast %106 : vector<1x1x1x1x128xf32> to vector<1x128xf32>
    %108 = vector.broadcast %107 : vector<1x128xf32> to vector<8x128xf32>
    %109 = arith.addf %105, %108 : vector<8x128xf32>
    %cst_118 = arith.constant 0.000000e+00 : f32
    %110 = vector.broadcast %cst_118 : f32 to vector<8x128xf32>
    %111 = arith.maximumf %109, %110 : vector<8x128xf32>
    %112 = arith.addf %91, %111 : vector<8x128xf32>
    %113 = arith.truncf %112 : vector<8x128xf32> to vector<8x128xbf16>
    %c1_119 = arith.constant 1 : index
    %c0_120 = arith.constant 0 : index
    %c0_121 = arith.constant 0 : index
    %114 = vector.load %arg5[%c1_119, %c0_120, %c0_121] : memref<2x128x128xbf16, #tpu.memory_space<vmem>>, vector<1x128x128xbf16>
    %115 = vector.shape_cast %114 : vector<1x128x128xbf16> to vector<128x128xbf16>
    %cst_122 = arith.constant dense<0.000000e+00> : vector<8x128xf32>
    %116 = tpu.matmul %113, %115, %cst_122 {dimension_numbers = #tpu.dot_dimension_numbers<[1], [0], [0], [1], [0, 0, 1, 1], [], []>} : vector<8x128xbf16>, vector<128x128xbf16>, vector<8x128xf32> -> vector<8x128xf32>
    %117 = arith.addf %61, %116 : vector<8x128xf32>
    %c1_123 = arith.constant 1 : index
    %c0_124 = arith.constant 0 : index
    %c0_125 = arith.constant 0 : index
    %118 = vector.load %arg6[%c1_123, %c0_124, %c0_125] : memref<2x1x128xf32, #tpu.memory_space<vmem>>, vector<1x1x128xf32>
    %119 = vector.shape_cast %118 : vector<1x1x128xf32> to vector<1x128xf32>
    %120 = vector.broadcast %119 : vector<1x128xf32> to vector<8x128xf32>
    %121 = arith.addf %117, %120 : vector<8x128xf32>
    %c0_126 = arith.constant 0 : index
    %c0_127 = arith.constant 0 : index
    %122 = vector.load %arg7[%c0_126, %c0_127] : memref<8x128xf32, #tpu.memory_space<vmem>>, vector<8x128xf32>
    tpu.vector_store %arg7[%c0_126, %c0_127], %121 {strides = array<i32>} : memref<8x128xf32, #tpu.memory_space<vmem>>, vector<8x128xf32>,
    return
  }
}

</mosaic_0001>

<bundles_post_ra>
// kernel: tpu_custom_call.1
= control target key start
LH: loop header
LB: loop body
LE: loop exit
PB: predicated region body
PF: predicated region fallthrough
CT: control target
= control target key end

     0   :  { %12 = vsyncpa [#allocation3], 0  ;;  %s2300_s0 = inlined_call_operand.hbm [shape: bf16[8,32], index: 0, kind: input, shape index: {}]   ;;  %s2301_s1 = inlined_call_operand.hbm [shape: bf16[2,32,128], index: 1, kind: input, shape index: {}]   ;;  %s2302_s2 = inlined_call_operand.vmem [shape: f32[2,1,128], index: 2, kind: input, shape index: {}]   ;;  %s2303_s3 = inlined_call_operand.hbm [shape: bf16[2,2,2,128,128], index: 3, kind: input, shape index: {}]   ;;  %s2304_s4 = inlined_call_operand.vmem [shape: f32[2,2,2,1,128], index: 4, kind: input, shape index: {}]   ;;  %s2305_s5 = inlined_call_operand.hbm [shape: bf16[2,128,128], index: 5, kind: input, shape index: {}]   ;;  %s2306_s6 = inlined_call_operand.vmem [shape: f32[2,1,128], index: 6, kind: input, shape index: {}]   ;;  %s2307_s7 = inlined_call_operand.hbm [shape: f32[8,128], index: 7, kind: output, shape index: {}]  }
   0x1   :  { %13 = vsyncpa [#allocation6], 0 }
   0x2   :  { %14 = vsyncpa [#allocation9], 0 }
   0x3   :  { %15 = vsyncpa [#allocation4], 0  ;;  %s2014_s24 = smov [#allocation5]   ;;  %s1896_s28 = scalar_lea.hbm %s2301_s1, 512 }
   0x4   :  { %s31_s25 = sshll.u32 %s2014_s24, 4  ;;  %p1897_p0 = scmp.ne.s32.totalorder %s2301_s1, %s1896_s28  ;;  %s32_s25 = int_to_ptr.vmem [resolvable:$true] %s31_s25 }
   0x5   :  { %p1900_p1 = scmp.lt.u32.totalorder %s1896_s28, %s2301_s1 }
   0x7   :  { %p1902_p2 = pnand %p1900_p1, %p1897_p0 }
   0x9   :  { %1905 = shalt.err (!%p1902_p2)
}
   0xa   :  { %s1906_s10 = scalar_lea.vmem %s32_s25, 512  ;;  %p1911_p4 = scmp.lt.s32.totalorder %s32_s25, %s32_s25 }
   0xb   :  { %p1907_p3 = scmp.ne.s32.totalorder %s32_s25, %s1906_s10  ;;  %p1912_p5 = scmp.lt.s32.totalorder %s1906_s10, %s1906_s10 }
   0xd   :  { %p1913_p6 = por %p1912_p5, %p1911_p4 }
   0xf   :  { %p1914_p7 = pnand %p1913_p6, %p1907_p3 }
  0x11   :  { %1917 = shalt.err (!%p1914_p7)
}
  0x12   :  { %s2015_s11 = smov 64   ;;  %s2016_s12 = smov 4  }
  0x13   :  { %37 = dma.hbm_to_vmem [thread:$0]  %s2301_s1, 512, %s32_s25, [#allocation6], %s2015_s11, %s2015_s11, %s2016_s12  }
  0x14   :  { %s2017_s15 = smov [#allocation2]   ;;  %s2018_s17 = smov [#allocation7]  }
  0x15   :  { %s22_s16 = sshll.u32 %s2017_s15, 4  ;;  %s45_s18 = sshll.u32 %s2018_s17, 4  ;;  %s23_s16 = int_to_ptr.vmem [resolvable:$true] %s22_s16  ;;  %s46_s18 = int_to_ptr.vmem [resolvable:$true] %s45_s18 }
  0x16   :  { %s1918_s21 = scalar_lea.hbm %s2300_s0, 64 }
  0x17   :  { %p1919_p8 = scmp.ne.s32.totalorder %s2300_s0, %s1918_s21  ;;  %p1922_p9 = scmp.lt.u32.totalorder %s1918_s21, %s2300_s0 }
  0x19   :  { %p1924_p10 = pnand %p1922_p9, %p1919_p8 }
  0x1b   :  { %1927 = shalt.err (!%p1924_p10)
}
  0x1c   :  { %s1928_s1 = scalar_lea.vmem %s23_s16, 64  ;;  %p1933_p12 = scmp.lt.s32.totalorder %s23_s16, %s23_s16 }
  0x1d   :  { %p1929_p11 = scmp.ne.s32.totalorder %s23_s16, %s1928_s1  ;;  %p1934_p13 = scmp.lt.s32.totalorder %s1928_s1, %s1928_s1 }
  0x1f   :  { %p1935_p0 = por %p1934_p13, %p1933_p12 }
  0x21   :  { %p1936_p1 = pnand %p1935_p0, %p1929_p11 }
  0x23   :  { %1939 = shalt.err (!%p1936_p1)
}
  0x24   :  { %25 = dma.hbm_to_vmem [thread:$0]  %s2300_s0, 64, %s23_s16, [#allocation3]  }
  0x25   :  { %s1940_s30 = scalar_lea.hbm %s2303_s3, 8192 }
  0x26   :  { %p1941_p2 = scmp.ne.s32.totalorder %s2303_s3, %s1940_s30  ;;  %p1944_p3 = scmp.lt.u32.totalorder %s1940_s30, %s2303_s3 }
  0x28   :  { %p1946_p4 = pnand %p1944_p3, %p1941_p2 }
  0x2a   :  { %1949 = shalt.err (!%p1946_p4)
}
  0x2b   :  { %s1950_s14 = scalar_lea.vmem %s46_s18, 8192  ;;  %p1955_p6 = scmp.lt.s32.totalorder %s46_s18, %s46_s18 }
  0x2c   :  { %p1951_p5 = scmp.ne.s32.totalorder %s46_s18, %s1950_s14  ;;  %p1956_p7 = scmp.lt.s32.totalorder %s1950_s14, %s1950_s14 }
  0x2e   :  { %p1957_p8 = por %p1956_p7, %p1955_p6 }
  0x30   :  { %p1958_p9 = pnand %p1957_p8, %p1951_p5 }
  0x32   :  { %1961 = shalt.err (!%p1958_p9)
}
  0x33   :  { %51 = dma.hbm_to_vmem [thread:$0]  %s2303_s3, 8192, %s46_s18, [#allocation6], %s2015_s11, %s2015_s11, %s2016_s12  }
  0x34   :  { %s2019_s16 = smov [#allocation8]   ;;  %s1962_s21 = scalar_lea.hbm %s2305_s5, 2048 }
  0x35   :  { %s59_s17 = sshll.u32 %s2019_s16, 4  ;;  %p1963_p10 = scmp.ne.s32.totalorder %s2305_s5, %s1962_s21  ;;  %s60_s17 = int_to_ptr.vmem [resolvable:$true] %s59_s17 }
  0x36   :  { %p1966_p11 = scmp.lt.u32.totalorder %s1962_s21, %s2305_s5 }
  0x38   :  { %p1968_p12 = pnand %p1966_p11, %p1963_p10 }
  0x3a   :  { %1971 = shalt.err (!%p1968_p12)
}
  0x3b   :  { %s1972_s1 = scalar_lea.vmem %s60_s17, 2048  ;;  %p1977_p0 = scmp.lt.s32.totalorder %s60_s17, %s60_s17 }
  0x3c   :  { %p1973_p13 = scmp.ne.s32.totalorder %s60_s17, %s1972_s1  ;;  %p1978_p1 = scmp.lt.s32.totalorder %s1972_s1, %s1972_s1 }
  0x3e   :  { %p1979_p2 = por %p1978_p1, %p1977_p0 }
  0x40   :  { %p1980_p3 = pnand %p1979_p2, %p1973_p13 }
  0x42   :  { %1983 = shalt.err (!%p1980_p3)
}
  0x43   :  { %65 = dma.hbm_to_vmem [thread:$0]  %s2305_s5, 2048, %s60_s17, [#allocation9], %s2015_s11, %s2015_s11, %s2016_s12  }
  0x44   :  { %2006 = dma.done.wait [#allocation3], 64  }
  0x45   :  { %2007 = vsyncadd [#allocation3], 4294967232 }
  0x46   :  { %2008 = dma.done.wait [#allocation6], 8704  }
  0x47   :  { %2009 = vsyncadd [#allocation6], 4294958592 }
  0x48   :  { %2010 = dma.done.wait [#allocation9], 2048  }
  0x49   :  { %2011 = vsyncadd [#allocation9], 4294965248  ;;  %v2020_v0 = vmov 0.0   ;;  %vm2021_vm0 = vmmov 0   ;;  %v1812_v1 = vld [vmem:[#allocation5] sm:$0xff]   ;;  %v1813_v2 = vld [vmem:[#allocation5 + $0x8] sm:$0xff]  }
  0x4a   :  { %1587 = vmatprep.subr.bf16.mxu1 %v2020_v0  ;;  %1591 = vmatprep.mubr.msk.bf16.mxu1 %vm2021_vm0, %v2020_v0  ;;  %v2127_v3 = vld [vmem:[#allocation2] sm:$0xf]  ;;  %vm105_vm1 = vcmask 261120   ;;  %v1814_v4 = vld [vmem:[#allocation7] sm:$0xff]   ;;  %v1815_v5 = vld [vmem:[#allocation7 + $0x8] sm:$0xff]  }
  0x4b   :  { %1615 = vmatprep.subr.bf16.mxu0 %v2020_v0  ;;  %1631 = vmatprep.mubr.msk.bf16.mxu0 %vm2021_vm0, %v2020_v0  ;;  %v1816_v6 = vld [vmem:[#allocation7 + $0x10] sm:$0xff]   ;;  %v1817_v7 = vld [vmem:[#allocation7 + $0x18] sm:$0xff]   ;;  %v1818_v8 = vld [vmem:[#allocation7 + $0x20] sm:$0xff]  }
  0x4c   :  { %1588 = vmatpush3.bf16.msra.mxu1 %v1812_v1  ;;  %v1819_v9 = vld [vmem:[#allocation7 + $0x28] sm:$0xff]   ;;  %v1820_v10 = vld [vmem:[#allocation7 + $0x30] sm:$0xff]   ;;  %v1821_v11 = vld [vmem:[#allocation7 + $0x38] sm:$0xff]  }
  0x4d   :  { %1589 = vmatprep.subr.bf16.mxu1 %v2020_v0  ;;  %v1822_v12 = vld [vmem:[#allocation7 + $0x40] sm:$0xff]   ;;  %v1823_v13 = vld [vmem:[#allocation7 + $0x48] sm:$0xff]   ;;  %v1824_v14 = vld [vmem:[#allocation7 + $0x50] sm:$0xff]  }
  0x4e   :  { %1616 = vmatpush3.bf16.msra.mxu0 %v1822_v12  ;;  %v1825_v15 = vld [vmem:[#allocation7 + $0x58] sm:$0xff]   ;;  %v1826_v16 = vld [vmem:[#allocation7 + $0x60] sm:$0xff]   ;;  %v1827_v17 = vld [vmem:[#allocation7 + $0x68] sm:$0xff]  }
  0x4f   :  { %1617 = vmatprep.subr.bf16.mxu0 %v2020_v0  ;;  %v1384_v18 = vld [vmem:[%s2302_s2] ss:$0 sm:$0xff]  ;;  %v1829_v27 = vld [vmem:[#allocation7 + $0x78] sm:$0xff]   ;;  %v1830_v28 = vld [vmem:[#allocation7 + $0x80] sm:$0xff]  }
  0x50   :  { %1590 = vmatpush3.bf16.msra.mxu1 %v1813_v2  ;;  %v1828_v26 = vld [vmem:[#allocation7 + $0x70] sm:$0xff]   ;;  %v1831_v29 = vld [vmem:[#allocation7 + $0x88] sm:$0xff]   ;;  %v1833_v31 = vld [vmem:[#allocation7 + $0x98] sm:$0xff]  }
  0x51   :  { %1595 = vmatprep.subr.bf16.mxu1 %v2020_v0  ;;  %v1832_v30 = vld [vmem:[#allocation7 + $0x90] sm:$0xff]   ;;  %v1834_v32 = vld [vmem:[#allocation7 + $0xa0] sm:$0xff]   ;;  %v1835_v33 = vld [vmem:[#allocation7 + $0xa8] sm:$0xff]  }
  0x52   :  { %1618 = vmatpush3.bf16.msra.mxu0 %v1823_v13  ;;  %v1388_v34 = vld [vmem:[%s2304_s4] ss:$0 sm:$0xff]  ;;  %v1837_v43 = vld [vmem:[#allocation7 + $0xb8] sm:$0xff]   ;;  %v1838_v44 = vld [vmem:[#allocation7 + $0xc0] sm:$0xff]  }
  0x53   :  { %1592 = vmatmul.mubr.msk.bf16.vlgmr.msra.gmra.mrb[0].mxu1 %vm105_vm1, %v2127_v3  ;;  %1619 = vmatprep.subr.bf16.mxu0 %v2020_v0  ;;  %v1836_v42 = vld [vmem:[#allocation7 + $0xb0] sm:$0xff]   ;;  %v1839_v45 = vld [vmem:[#allocation7 + $0xc8] sm:$0xff]   ;;  %v1841_v47 = vld [vmem:[#allocation7 + $0xd8] sm:$0xff]  }
  0x54   :  { %1596 = vmatpush3.bf16.msra.mxu1 %v1814_v4  ;;  %1611 = vmatprep.mubr.msk.bf16.mxu1 %vm2021_vm0, %v2020_v0  ;;  %v1840_v46 = vld [vmem:[#allocation7 + $0xd0] sm:$0xff]   ;;  %v1842_v48 = vld [vmem:[#allocation7 + $0xe0] sm:$0xff]   ;;  %v1843_v49 = vld [vmem:[#allocation7 + $0xe8] sm:$0xff]  }
  0x55   :  { %1597 = vmatprep.subr.bf16.mxu1 %v2020_v0  ;;  %v1844_v50 = vld [vmem:[#allocation7 + $0xf0] sm:$0xff]   ;;  %v1845_v60 = vld [vmem:[#allocation7 + $0xf8] sm:$0xff]   ;;  %v1848_v61 = vld [vmem:[#allocation8] sm:$0xff]  }
  0x56   :  { %1620 = vmatpush3.bf16.msra.mxu0 %v1824_v14  ;;  %v1398_v51 = vld [vmem:[%s2304_s4 + $0x1] ss:$0 sm:$0xff]  ;;  %v1849_v62 = vld [vmem:[#allocation8 + $0x8] sm:$0xff]   ;;  %v1853_v1 = vld [vmem:[#allocation8 + $0x18] sm:$0xff]  }
  0x57   :  { %1621 = vmatprep.subr.bf16.mxu0 %v2020_v0  ;;  %v1851_v63 = vld [vmem:[#allocation8 + $0x10] sm:$0xff]   ;;  %v1855_v2 = vld [vmem:[#allocation8 + $0x20] sm:$0xff]   ;;  %v1857_v4 = vld [vmem:[#allocation8 + $0x28] sm:$0xff]  }
  0x58   :  { %1598 = vmatpush3.bf16.msra.mxu1 %v1815_v5  ;;  %v1408_v5 = vld [vmem:[%s2304_s4 + $0x2] ss:$0 sm:$0xff]  ;;  %v1847_v14 = vld [vmem:[#allocation5 + $0x18] sm:$0xff]  }
  0x59   :  { %1599 = vmatprep.subr.bf16.mxu1 %v2020_v0  ;;  %v1846_v12 = vld [vmem:[#allocation5 + $0x10] sm:$0xff]  }
  0x5a   :  { %1622 = vmatpush3.bf16.msra.mxu0 %v1825_v15  ;;  %v1850_v15 = vld [vmem:[#allocation7 + $0x100] sm:$0xff]  }
  0x5b   :  { %1623 = vmatprep.subr.bf16.mxu0 %v2020_v0 }
  0x5c   :  { %1600 = vmatpush3.bf16.msra.mxu1 %v1816_v6 }
  0x5d   :  { %1601 = vmatprep.subr.bf16.mxu1 %v2020_v0 }
  0x5e   :  { %1624 = vmatpush3.bf16.msra.mxu0 %v1826_v16  ;;  %v1852_v16 = vld [vmem:[#allocation7 + $0x108] sm:$0xff]  }
  0x5f   :  { %1625 = vmatprep.subr.bf16.mxu0 %v2020_v0 }
  0x60   :  { %1602 = vmatpush3.bf16.msra.mxu1 %v1817_v7 }
  0x61   :  { %1603 = vmatprep.subr.bf16.mxu1 %v2020_v0 }
  0x62   :  { %1626 = vmatpush3.bf16.msra.mxu0 %v1827_v17  ;;  %v1854_v17 = vld [vmem:[#allocation7 + $0x110] sm:$0xff]  }
  0x63   :  { %1627 = vmatprep.subr.bf16.mxu0 %v2020_v0 }
  0x64   :  { %1604 = vmatpush3.bf16.msra.mxu1 %v1818_v8 }
  0x65   :  { %1605 = vmatprep.subr.bf16.mxu1 %v2020_v0 }
  0x66   :  { %1628 = vmatpush3.bf16.msra.mxu0 %v1828_v26 }
  0x67   :  { %1629 = vmatprep.subr.bf16.mxu0 %v2020_v0 }
  0x68   :  { %1606 = vmatpush3.bf16.msra.mxu1 %v1819_v9 }
  0x69   :  { %1607 = vmatprep.subr.bf16.mxu1 %v2020_v0 }
  0x6a   :  { %1630 = vmatpush3.bf16.msra.mxu0 %v1829_v27 }
  0x6b   :  { %1655 = vmatprep.subr.bf16.mxu0 %v2020_v0 }
  0x6c   :  { %1608 = vmatpush3.bf16.msra.mxu1 %v1820_v10 }
  0x6d   :  { %1609 = vmatprep.subr.bf16.mxu1 %v2020_v0 }
  0x70   :  { %1610 = vmatpush3.bf16.msra.mxu1 %v1821_v11 }
  0x71   :  { %1635 = vmatprep.subr.bf16.mxu1 %v2020_v0 }
 0x126   :  { %v143_v19 = vpop.f32.mrb[0].mxu1 }
 0x127   :  { %v144_v20 = vadd.f32 %v1384_v18, %v143_v19  ;;  %v1593_v21 = vpop.f32.mrb[1].mxu1  ;;  %v1856_v18 = vld [vmem:[#allocation7 + $0x118] sm:$0xff]   ;;  %v1858_v19 = vld [vmem:[#allocation7 + $0x120] sm:$0xff]  }
 0x128   :  { %v146_v22 = vpop.f32.mrb[2].mxu1  ;;  %v1861_v21 = vld [vmem:[#allocation8 + $0x38] sm:$0xff]  }
 0x129   :  { %v2151_v23 = vmax.f32 %v144_v20, 0.0  ;;  %v1594_v24 = vpop.f32.mrb[3].mxu1  ;;  %v1860_v20 = vld [vmem:[#allocation7 + $0x128] sm:$0xff]   ;;  %v1862_v22 = vld [vmem:[#allocation7 + $0x130] sm:$0xff]  }
 0x12a   :  { %v1418_v24 = vld [vmem:[%s2304_s4 + $0x3] ss:$0 sm:$0xff] }
 0x12b   :  { %v150_v25 = vpack.c.bf16 %v2151_v23, %v2151_v23 }
 0x12d   :  { %1612 = vmatmul.mubr.bf16.vlgmr.msra.gmra.mrb[4].mxu1 %v150_v25 }
 0x12e   :  { %1651 = vmatprep.mubr.msk.bf16.mxu1 %vm2021_vm0, %v2020_v0  ;;  %1636 = vmatpush3.bf16.msra.mxu1 %v1830_v28 }
 0x12f   :  { %1637 = vmatprep.subr.bf16.mxu1 %v2020_v0 }
 0x132   :  { %1638 = vmatpush3.bf16.msra.mxu1 %v1831_v29 }
 0x133   :  { %1639 = vmatprep.subr.bf16.mxu1 %v2020_v0 }
 0x136   :  { %1640 = vmatpush3.bf16.msra.mxu1 %v1832_v30 }
 0x137   :  { %1641 = vmatprep.subr.bf16.mxu1 %v2020_v0 }
 0x13a   :  { %1642 = vmatpush3.bf16.msra.mxu1 %v1833_v31 }
 0x13b   :  { %1643 = vmatprep.subr.bf16.mxu1 %v2020_v0 }
 0x13e   :  { %1644 = vmatpush3.bf16.msra.mxu1 %v1834_v32  ;;  %v1437_v32 = vld [vmem:[%s2302_s2 + $0x1] ss:$0 sm:$0xff] }
 0x13f   :  { %1645 = vmatprep.subr.bf16.mxu1 %v2020_v0 }
 0x142   :  { %1646 = vmatpush3.bf16.msra.mxu1 %v1835_v33  ;;  %v1864_v33 = vld [vmem:[#allocation7 + $0x140] sm:$0xff]  }
 0x143   :  { %1647 = vmatprep.subr.bf16.mxu1 %v2020_v0 }
 0x146   :  { %1648 = vmatpush3.bf16.msra.mxu1 %v1836_v42 }
 0x147   :  { %1649 = vmatprep.subr.bf16.mxu1 %v2020_v0 }
 0x14a   :  { %1650 = vmatpush3.bf16.msra.mxu1 %v1837_v43  ;;  %v1866_v43 = vld [vmem:[#allocation7 + $0x150] sm:$0xff]  }
 0x14b   :  { %1675 = vmatprep.subr.bf16.mxu1 %v2020_v0 }
 0x200   :  { %v256_v35 = vpop.f32.mrb[4].mxu1 }
 0x201   :  { %v257_v36 = vadd.f32 %v1388_v34, %v256_v35  ;;  %v1613_v37 = vpop.f32.mrb[5].mxu1 }
 0x202   :  { %v259_v38 = vpop.f32.mrb[6].mxu1 }
 0x203   :  { %v262_v39 = vmax.f32 %v257_v36, 0.0  ;;  %v1614_v40 = vpop.f32.mrb[7].mxu1 }
 0x205   :  { %v263_v41 = vpack.c.bf16 %v262_v39, %v262_v39  ;;  %v1865_v39 = vld [vmem:[#allocation7 + $0x148] sm:$0xff]  }
 0x207   :  { %1632 = vmatmul.mubr.bf16.vlgmr.msra.gmra.mrb[0].mxu0 %v263_v41 }
 0x208   :  { %1671 = vmatprep.mubr.msk.bf16.mxu0 %vm2021_vm0, %v2020_v0  ;;  %1656 = vmatpush3.bf16.msra.mxu0 %v1838_v44  ;;  %v1867_v44 = vld [vmem:[#allocation7 + $0x158] sm:$0xff]  }
 0x209   :  { %1657 = vmatprep.subr.bf16.mxu0 %v2020_v0 }
 0x20c   :  { %1658 = vmatpush3.bf16.msra.mxu0 %v1839_v45  ;;  %v1868_v45 = vld [vmem:[#allocation7 + $0x160] sm:$0xff]  }
 0x20d   :  { %1659 = vmatprep.subr.bf16.mxu0 %v2020_v0 }
 0x210   :  { %1660 = vmatpush3.bf16.msra.mxu0 %v1840_v46  ;;  %v1869_v46 = vld [vmem:[#allocation7 + $0x168] sm:$0xff]  }
 0x211   :  { %1661 = vmatprep.subr.bf16.mxu0 %v2020_v0 }
 0x214   :  { %1662 = vmatpush3.bf16.msra.mxu0 %v1841_v47  ;;  %v1870_v47 = vld [vmem:[#allocation7 + $0x170] sm:$0xff]  }
 0x215   :  { %1663 = vmatprep.subr.bf16.mxu0 %v2020_v0 }
 0x218   :  { %1664 = vmatpush3.bf16.msra.mxu0 %v1842_v48  ;;  %v1871_v48 = vld [vmem:[#allocation7 + $0x178] sm:$0xff]  }
 0x219   :  { %1665 = vmatprep.subr.bf16.mxu0 %v2020_v0 }
 0x21c   :  { %1666 = vmatpush3.bf16.msra.mxu0 %v1843_v49  ;;  %v1872_v49 = vld [vmem:[#allocation7 + $0x180] sm:$0xff]  }
 0x21d   :  { %1667 = vmatprep.subr.bf16.mxu0 %v2020_v0 }
 0x220   :  { %1668 = vmatpush3.bf16.msra.mxu0 %v1844_v50  ;;  %v1873_v50 = vld [vmem:[#allocation7 + $0x188] sm:$0xff]  }
 0x221   :  { %1669 = vmatprep.subr.bf16.mxu0 %v2020_v0 }
 0x224   :  { %1670 = vmatpush3.bf16.msra.mxu0 %v1845_v60 }
 0x225   :  { %1695 = vmatprep.subr.bf16.mxu0 %v2020_v0 }
 0x2da   :  { %v371_v52 = vpop.f32.mrb[0].mxu0 }
 0x2db   :  { %v372_v53 = vadd.f32 %v1398_v51, %v371_v52  ;;  %v1633_v54 = vpop.f32.mrb[1].mxu0  ;;  %v1874_v51 = vld [vmem:[#allocation7 + $0x190] sm:$0xff]   ;;  %v1875_v52 = vld [vmem:[#allocation7 + $0x198] sm:$0xff]  }
 0x2dc   :  { %v374_v55 = vpop.f32.mrb[2].mxu0  ;;  %v1877_v54 = vld [vmem:[#allocation7 + $0x1a8] sm:$0xff]  }
 0x2dd   :  { %v377_v56 = vmax.f32 %v372_v53, 0.0  ;;  %v1634_v57 = vpop.f32.mrb[3].mxu0  ;;  %v1876_v53 = vld [vmem:[#allocation7 + $0x1a0] sm:$0xff]  }
 0x2df   :  { %v2183_v58 = vadd.f32 %v377_v56, %v2151_v23  ;;  %v1863_v23 = vld [vmem:[#allocation7 + $0x138] sm:$0xff]  }
 0x2e1   :  { %v379_v59 = vpack.c.bf16 %v2183_v58, %v2183_v58 }
 0x2e3   :  { %1652 = vmatmul.mubr.bf16.vlgmr.msra.gmra.mrb[8].mxu1 %v379_v59  ;;  %v1442_v59 = vld [vmem:[%s2304_s4 + $0x4] ss:$0 sm:$0xff] }
 0x2e4   :  { %1691 = vmatprep.mubr.msk.bf16.mxu1 %vm2021_vm0, %v2020_v0  ;;  %1676 = vmatpush3.bf16.msra.mxu1 %v1848_v61 }
 0x2e5   :  { %1677 = vmatprep.subr.bf16.mxu1 %v2020_v0 }
 0x2e8   :  { %1678 = vmatpush3.bf16.msra.mxu1 %v1849_v62 }
 0x2e9   :  { %1679 = vmatprep.subr.bf16.mxu1 %v2020_v0 }
 0x2ec   :  { %1680 = vmatpush3.bf16.msra.mxu1 %v1851_v63 }
 0x2ed   :  { %1681 = vmatprep.subr.bf16.mxu1 %v2020_v0 }
 0x2f0   :  { %1682 = vmatpush3.bf16.msra.mxu1 %v1853_v1 }
 0x2f1   :  { %1683 = vmatprep.subr.bf16.mxu1 %v2020_v0 }
 0x2f4   :  { %1684 = vmatpush3.bf16.msra.mxu1 %v1855_v2 }
 0x2f5   :  { %1685 = vmatprep.subr.bf16.mxu1 %v2020_v0 }
 0x2f8   :  { %1686 = vmatpush3.bf16.msra.mxu1 %v1857_v4 }
 0x2f9   :  { %1687 = vmatprep.subr.bf16.mxu1 %v2020_v0 }
 0x3b6   :  { %v487_v6 = vpop.f32.mrb[8].mxu1 }
 0x3b7   :  { %v488_v7 = vadd.f32 %v1408_v5, %v487_v6  ;;  %v1653_v8 = vpop.f32.mrb[9].mxu1  ;;  %v1878_v5 = vld [vmem:[#allocation7 + $0x1b0] sm:$0xff]   ;;  %v1879_v6 = vld [vmem:[#allocation7 + $0x1b8] sm:$0xff]  }
 0x3b8   :  { %v490_v9 = vpop.f32.mrb[10].mxu1  ;;  %v1881_v8 = vld [vmem:[#allocation7 + $0x1c8] sm:$0xff]  }
 0x3b9   :  { %v493_v10 = vmax.f32 %v488_v7, 0.0  ;;  %v1654_v11 = vpop.f32.mrb[11].mxu1  ;;  %v1880_v7 = vld [vmem:[#allocation7 + $0x1c0] sm:$0xff]   ;;  %v1882_v9 = vld [vmem:[#allocation7 + $0x1d0] sm:$0xff]  }
 0x3ba   :  { %v1884_v11 = vld [vmem:[#allocation7 + $0x1e0] sm:$0xff]  }
 0x3bb   :  { %v494_v13 = vpack.c.bf16 %v493_v10, %v493_v10  ;;  %v1883_v10 = vld [vmem:[#allocation7 + $0x1d8] sm:$0xff]  }
 0x3bd   :  { %1672 = vmatmul.mubr.bf16.vlgmr.msra.gmra.mrb[4].mxu0 %v494_v13  ;;  %v1452_v13 = vld [vmem:[%s2304_s4 + $0x5] ss:$0 sm:$0xff] }
 0x3be   :  { %1696 = vmatpush3.bf16.msra.mxu0 %v1846_v12  ;;  %1699 = vmatprep.mubr.msk.bf16.mxu0 %vm2021_vm0, %v2020_v0  ;;  %v1885_v12 = vld [vmem:[#allocation7 + $0x1e8] sm:$0xff]  }
 0x3bf   :  { %1697 = vmatprep.subr.bf16.mxu0 %v2020_v0 }
 0x3c2   :  { %1698 = vmatpush3.bf16.msra.mxu0 %v1847_v14 }
 0x3c3   :  { %1703 = vmatprep.subr.bf16.mxu0 %v2020_v0 }
 0x3c5   :  { %1700 = vmatmul.mubr.msk.bf16.vlgmr.msra.gmra.mrb[8].mxu0 %vm105_vm1, %v2127_v3  ;;  %v1859_v3 = vld [vmem:[#allocation8 + $0x30] sm:$0xff]  }
 0x3c6   :  { %1704 = vmatpush3.bf16.msra.mxu0 %v1850_v15  ;;  %1719 = vmatprep.mubr.msk.bf16.mxu0 %vm2021_vm0, %v2020_v0 }
 0x3c7   :  { %1705 = vmatprep.subr.bf16.mxu0 %v2020_v0  ;;  %1688 = vmatpush3.bf16.msra.mxu1 %v1859_v3 }
 0x3c8   :  { %1689 = vmatprep.subr.bf16.mxu1 %v2020_v0 }
 0x3ca   :  { %1706 = vmatpush3.bf16.msra.mxu0 %v1852_v16 }
 0x3cb   :  { %1707 = vmatprep.subr.bf16.mxu0 %v2020_v0  ;;  %1690 = vmatpush3.bf16.msra.mxu1 %v1861_v21  ;;  %v1886_v21 = vld [vmem:[#allocation7 + $0x1f0] sm:$0xff]  }
 0x3cc   :  { %1723 = vmatprep.subr.bf16.mxu1 %v2020_v0 }
 0x3ce   :  { %1708 = vmatpush3.bf16.msra.mxu0 %v1854_v17 }
 0x3cf   :  { %1709 = vmatprep.subr.bf16.mxu0 %v2020_v0 }
 0x3d2   :  { %1710 = vmatpush3.bf16.msra.mxu0 %v1856_v18 }
 0x3d3   :  { %1711 = vmatprep.subr.bf16.mxu0 %v2020_v0 }
 0x3d6   :  { %1712 = vmatpush3.bf16.msra.mxu0 %v1858_v19 }
 0x3d7   :  { %1713 = vmatprep.subr.bf16.mxu0 %v2020_v0 }
 0x3da   :  { %1714 = vmatpush3.bf16.msra.mxu0 %v1860_v20 }
 0x3db   :  { %1715 = vmatprep.subr.bf16.mxu0 %v2020_v0 }
 0x3de   :  { %1716 = vmatpush3.bf16.msra.mxu0 %v1862_v22  ;;  %v1887_v22 = vld [vmem:[#allocation7 + $0x1f8] sm:$0xff]  }
 0x3df   :  { %1717 = vmatprep.subr.bf16.mxu0 %v2020_v0 }
 0x3e2   :  { %1718 = vmatpush3.bf16.msra.mxu0 %v1863_v23  ;;  %v1888_v23 = vld [vmem:[#allocation8 + $0x40] sm:$0xff]  }
 0x3e3   :  { %1743 = vmatprep.subr.bf16.mxu0 %v2020_v0 }
 0x490   :  { %v602_v25 = vpop.f32.mrb[4].mxu0 }
 0x491   :  { %v603_v26 = vadd.f32 %v1418_v24, %v602_v25  ;;  %v1673_v27 = vpop.f32.mrb[5].mxu0  ;;  %v1889_v24 = vld [vmem:[#allocation8 + $0x48] sm:$0xff]   ;;  %v1890_v25 = vld [vmem:[#allocation8 + $0x50] sm:$0xff]  }
 0x492   :  { %v605_v28 = vpop.f32.mrb[6].mxu0  ;;  %v1892_v27 = vld [vmem:[#allocation8 + $0x60] sm:$0xff]  }
 0x493   :  { %v608_v29 = vmax.f32 %v603_v26, 0.0  ;;  %v1674_v30 = vpop.f32.mrb[7].mxu0  ;;  %v1891_v26 = vld [vmem:[#allocation8 + $0x58] sm:$0xff]   ;;  %v1893_v28 = vld [vmem:[#allocation8 + $0x68] sm:$0xff]  }
 0x495   :  { %v609_v31 = vadd.f32 %v608_v29, %v2183_v58  ;;  %v1462_v29 = vld [vmem:[%s2304_s4 + $0x6] ss:$0 sm:$0xff] }
 0x497   :  { %v610_v34 = vpack.c.bf16 %v609_v31, %v609_v31 }
 0x498   :  { %v781_v35 = vpop.f32.mrb[8].mxu0 }
 0x499   :  { %v782_v36 = vadd.f32 %v1437_v32, %v781_v35  ;;  %1692 = vmatmul.mubr.bf16.vlgmr.msra.gmra.mrb[12].mxu1 %v610_v34  ;;  %v1701_v37 = vpop.f32.mrb[9].mxu0 }
 0x49a   :  { %v784_v38 = vpop.f32.mrb[10].mxu0  ;;  %1724 = vmatpush3.bf16.msra.mxu1 %v1864_v33  ;;  %1739 = vmatprep.mubr.msk.bf16.mxu1 %vm2021_vm0, %v2020_v0  ;;  %v1894_v37 = vld [vmem:[#allocation8 + $0x70] sm:$0xff]  }
 0x49b   :  { %v2226_v40 = vmax.f32 %v782_v36, 0.0  ;;  %v1702_v41 = vpop.f32.mrb[11].mxu0  ;;  %1725 = vmatprep.subr.bf16.mxu1 %v2020_v0  ;;  %v1895_v38 = vld [vmem:[#allocation8 + $0x78] sm:$0xff]  }
 0x49d   :  { %v788_v42 = vpack.c.bf16 %v2226_v40, %v2226_v40 }
 0x49e   :  { %1726 = vmatpush3.bf16.msra.mxu1 %v1865_v39  ;;  %v1472_v39 = vld [vmem:[%s2304_s4 + $0x7] ss:$0 sm:$0xff]  ;;  %s2022_s4 = smov [#allocation10]  }
 0x49f   :  { %1720 = vmatmul.mubr.bf16.vlgmr.msra.gmra.mrb[12].mxu0 %v788_v42  ;;  %1727 = vmatprep.subr.bf16.mxu1 %v2020_v0  ;;  %s1373_s26 = sshll.u32 %s2022_s4, 4  ;;  %s1374_s26 = int_to_ptr.vmem [resolvable:$true] %s1373_s26 }
 0x4a0   :  { %1759 = vmatprep.mubr.msk.bf16.mxu0 %vm2021_vm0, %v2020_v0  ;;  %1744 = vmatpush3.bf16.msra.mxu0 %v1872_v49  ;;  %s1984_s1 = scalar_lea.vmem %s1374_s26, 128  ;;  %p1989_p5 = scmp.lt.s32.totalorder %s1374_s26, %s1374_s26 }
 0x4a1   :  { %1745 = vmatprep.subr.bf16.mxu0 %v2020_v0  ;;  %p1985_p4 = scmp.ne.s32.totalorder %s1374_s26, %s1984_s1  ;;  %p1990_p6 = scmp.lt.s32.totalorder %s1984_s1, %s1984_s1 }
 0x4a2   :  { %1728 = vmatpush3.bf16.msra.mxu1 %v1866_v43 }
 0x4a3   :  { %1729 = vmatprep.subr.bf16.mxu1 %v2020_v0  ;;  %p1991_p7 = por %p1990_p6, %p1989_p5 }
 0x4a4   :  { %1746 = vmatpush3.bf16.msra.mxu0 %v1873_v50  ;;  %v1490_v50 = vld [vmem:[%s2306_s6 + $0x1] ss:$0 sm:$0xff] }
 0x4a5   :  { %1747 = vmatprep.subr.bf16.mxu0 %v2020_v0  ;;  %p1992_p8 = pnand %p1991_p7, %p1985_p4 }
 0x4a6   :  { %1730 = vmatpush3.bf16.msra.mxu1 %v1867_v44 }
 0x4a7   :  { %1731 = vmatprep.subr.bf16.mxu1 %v2020_v0 }
 0x4a8   :  { %1748 = vmatpush3.bf16.msra.mxu0 %v1874_v51 }
 0x4a9   :  { %1749 = vmatprep.subr.bf16.mxu0 %v2020_v0 }
 0x4aa   :  { %1732 = vmatpush3.bf16.msra.mxu1 %v1868_v45 }
 0x4ab   :  { %1733 = vmatprep.subr.bf16.mxu1 %v2020_v0 }
 0x4ac   :  { %1750 = vmatpush3.bf16.msra.mxu0 %v1875_v52 }
 0x4ad   :  { %1751 = vmatprep.subr.bf16.mxu0 %v2020_v0 }
 0x4ae   :  { %1734 = vmatpush3.bf16.msra.mxu1 %v1869_v46 }
 0x4af   :  { %1735 = vmatprep.subr.bf16.mxu1 %v2020_v0 }
 0x4b0   :  { %1752 = vmatpush3.bf16.msra.mxu0 %v1876_v53 }
 0x4b1   :  { %1753 = vmatprep.subr.bf16.mxu0 %v2020_v0 }
 0x4b2   :  { %1736 = vmatpush3.bf16.msra.mxu1 %v1870_v47 }
 0x4b3   :  { %1737 = vmatprep.subr.bf16.mxu1 %v2020_v0 }
 0x4b4   :  { %1754 = vmatpush3.bf16.msra.mxu0 %v1877_v54 }
 0x4b5   :  { %1755 = vmatprep.subr.bf16.mxu0 %v2020_v0 }
 0x4b6   :  { %1738 = vmatpush3.bf16.msra.mxu1 %v1871_v48  ;;  %v1427_v48 = vld [vmem:[%s2306_s6] ss:$0 sm:$0xff] }
 0x4b7   :  { %1763 = vmatprep.subr.bf16.mxu1 %v2020_v0 }
 0x4b8   :  { %1756 = vmatpush3.bf16.msra.mxu0 %v1878_v5 }
 0x4b9   :  { %1757 = vmatprep.subr.bf16.mxu0 %v2020_v0 }
 0x4bc   :  { %1758 = vmatpush3.bf16.msra.mxu0 %v1879_v6 }
 0x4bd   :  { %1783 = vmatprep.subr.bf16.mxu0 %v2020_v0 }
 0x56c   :  { %v2246_v55 = vpop.f32.mrb[12].mxu1 }
 0x56d   :  { %v1693_v56 = vpop.f32.mrb[13].mxu1 }
 0x56e   :  { %v719_v57 = vpop.f32.mrb[14].mxu1 }
 0x56f   :  { %v1694_v58 = vpop.f32.mrb[15].mxu1 }
 0x572   :  { %v896_v60 = vpop.f32.mrb[12].mxu0 }
 0x573   :  { %v897_v61 = vadd.f32 %v1442_v59, %v896_v60  ;;  %v1721_v62 = vpop.f32.mrb[13].mxu0 }
 0x574   :  { %v899_v63 = vpop.f32.mrb[14].mxu0 }
 0x575   :  { %v902_v1 = vmax.f32 %v897_v61, 0.0  ;;  %v1722_v2 = vpop.f32.mrb[15].mxu0 }
 0x577   :  { %v903_v4 = vpack.c.bf16 %v902_v1, %v902_v1 }
 0x579   :  { %1740 = vmatmul.mubr.bf16.vlgmr.msra.gmra.mrb[16].mxu1 %v903_v4 }
 0x57a   :  { %1779 = vmatprep.mubr.msk.bf16.mxu1 %vm2021_vm0, %v2020_v0  ;;  %1764 = vmatpush3.bf16.msra.mxu1 %v1880_v7 }
 0x57b   :  { %1765 = vmatprep.subr.bf16.mxu1 %v2020_v0 }
 0x57e   :  { %1766 = vmatpush3.bf16.msra.mxu1 %v1881_v8 }
 0x57f   :  { %1767 = vmatprep.subr.bf16.mxu1 %v2020_v0 }
 0x582   :  { %1768 = vmatpush3.bf16.msra.mxu1 %v1882_v9 }
 0x583   :  { %1769 = vmatprep.subr.bf16.mxu1 %v2020_v0 }
 0x586   :  { %1770 = vmatpush3.bf16.msra.mxu1 %v1883_v10 }
 0x587   :  { %1771 = vmatprep.subr.bf16.mxu1 %v2020_v0 }
 0x58a   :  { %1772 = vmatpush3.bf16.msra.mxu1 %v1884_v11 }
 0x58b   :  { %1773 = vmatprep.subr.bf16.mxu1 %v2020_v0 }
 0x58e   :  { %1774 = vmatpush3.bf16.msra.mxu1 %v1885_v12 }
 0x58f   :  { %1775 = vmatprep.subr.bf16.mxu1 %v2020_v0 }
 0x592   :  { %1776 = vmatpush3.bf16.msra.mxu1 %v1886_v21 }
 0x593   :  { %1777 = vmatprep.subr.bf16.mxu1 %v2020_v0 }
 0x596   :  { %1778 = vmatpush3.bf16.msra.mxu1 %v1887_v22 }
 0x64c   :  { %v1011_v14 = vpop.f32.mrb[16].mxu1 }
 0x64d   :  { %v1012_v15 = vadd.f32 %v1452_v13, %v1011_v14  ;;  %v1741_v16 = vpop.f32.mrb[17].mxu1 }
 0x64e   :  { %v1014_v17 = vpop.f32.mrb[18].mxu1 }
 0x64f   :  { %v1017_v18 = vmax.f32 %v1012_v15, 0.0  ;;  %v1742_v19 = vpop.f32.mrb[19].mxu1 }
 0x651   :  { %v1018_v3 = vadd.f32 %v1017_v18, %v2226_v40 }
 0x653   :  { %v1019_v20 = vpack.c.bf16 %v1018_v3, %v1018_v3 }
 0x655   :  { %1760 = vmatmul.mubr.bf16.vlgmr.msra.gmra.mrb[16].mxu0 %v1019_v20 }
 0x656   :  { %1799 = vmatprep.mubr.msk.bf16.mxu0 %vm2021_vm0, %v2020_v0  ;;  %1784 = vmatpush3.bf16.msra.mxu0 %v1888_v23 }
 0x657   :  { %1785 = vmatprep.subr.bf16.mxu0 %v2020_v0 }
 0x65a   :  { %1786 = vmatpush3.bf16.msra.mxu0 %v1889_v24 }
 0x65b   :  { %1787 = vmatprep.subr.bf16.mxu0 %v2020_v0 }
 0x65e   :  { %1788 = vmatpush3.bf16.msra.mxu0 %v1890_v25 }
 0x65f   :  { %1789 = vmatprep.subr.bf16.mxu0 %v2020_v0 }
 0x662   :  { %1790 = vmatpush3.bf16.msra.mxu0 %v1891_v26 }
 0x663   :  { %1791 = vmatprep.subr.bf16.mxu0 %v2020_v0 }
 0x666   :  { %1792 = vmatpush3.bf16.msra.mxu0 %v1892_v27 }
 0x667   :  { %1793 = vmatprep.subr.bf16.mxu0 %v2020_v0 }
 0x66a   :  { %1794 = vmatpush3.bf16.msra.mxu0 %v1893_v28 }
 0x66b   :  { %1795 = vmatprep.subr.bf16.mxu0 %v2020_v0 }
 0x66e   :  { %1796 = vmatpush3.bf16.msra.mxu0 %v1894_v37 }
 0x66f   :  { %1797 = vmatprep.subr.bf16.mxu0 %v2020_v0  ;;  %v717_v0 = vadd.f32 %v1427_v48, %v2246_v55 }
 0x672   :  { %1798 = vmatpush3.bf16.msra.mxu0 %v1895_v38 }
 0x728   :  { %v1127_v30 = vpop.f32.mrb[16].mxu0 }
 0x729   :  { %v1128_v31 = vadd.f32 %v1462_v29, %v1127_v30  ;;  %v1761_v32 = vpop.f32.mrb[17].mxu0 }
 0x72a   :  { %v1130_v33 = vpop.f32.mrb[18].mxu0 }
 0x72b   :  { %v1133_v34 = vmax.f32 %v1128_v31, 0.0  ;;  %v1762_v35 = vpop.f32.mrb[19].mxu0 }
 0x72d   :  { %v1134_v36 = vpack.c.bf16 %v1133_v34, %v1133_v34 }
 0x72f   :  { %1780 = vmatmul.mubr.bf16.vlgmr.msra.gmra.mrb[20].mxu1 %v1134_v36 }
 0x802   :  { %v1242_v40 = vpop.f32.mrb[20].mxu1 }
 0x803   :  { %v1243_v41 = vadd.f32 %v1472_v39, %v1242_v40  ;;  %v1781_v42 = vpop.f32.mrb[21].mxu1 }
 0x804   :  { %v1245_v43 = vpop.f32.mrb[22].mxu1 }
 0x805   :  { %v1248_v44 = vmax.f32 %v1243_v41, 0.0  ;;  %v1782_v45 = vpop.f32.mrb[23].mxu1 }
 0x807   :  { %v1249_v46 = vadd.f32 %v1248_v44, %v1018_v3 }
 0x809   :  { %v1250_v47 = vpack.c.bf16 %v1249_v46, %v1249_v46 }
 0x80b   :  { %1800 = vmatmul.mubr.bf16.vlgmr.msra.gmra.mrb[20].mxu0 %v1250_v47 }
 0x8de   :  { %v1350_v49 = vpop.f32.mrb[20].mxu0 }
 0x8df   :  { %v1356_v51 = vadd.f32 %v1350_v49, %v717_v0  ;;  %v1801_v52 = vpop.f32.mrb[21].mxu0 }
 0x8e0   :  { %v1353_v53 = vpop.f32.mrb[22].mxu0 }
 0x8e1   :  { %v1365_v54 = vadd.f32 %v1490_v50, %v1356_v51  ;;  %v1802_v56 = vpop.f32.mrb[23].mxu0 }
 0x8e3   :  { %1366 = vst [vmem:[#allocation10] sm:$0xff] %v1365_v54 }
 0x8e4   :  { %1995 = shalt.err (!%p1992_p8)
}
 0x8e5   :  { %s1996_s6 = scalar_lea.hbm %s2307_s7, 128 }
 0x8e6   :  { %p1997_p9 = scmp.ne.s32.totalorder %s2307_s7, %s1996_s6  ;;  %p2000_p10 = scmp.lt.u32.totalorder %s1996_s6, %s2307_s7 }
 0x8e8   :  { %p2002_p11 = pnand %p2000_p10, %p1997_p9 }
 0x8ea   :  { %2005 = shalt.err (!%p2002_p11)
}
 0x8eb   :  { %1376 = dma.vmem_to_hbm [thread:$0]  %s1374_s26, 128, %s2307_s7, [#allocation4]  }
 0x8ec   :  { %2012 = dma.done.wait [#allocation4], 128  }
 0x8ed   :  { %2013 = vsyncadd [#allocation4], 4294967168 }
 0x8ee   :  { %1380 = vsyncpa [#allocation3], 1 }
 0x8ef   :  { %1381 = vsyncpa [#allocation6], 1 }
 0x8f0   :  { %1382 = vsyncpa [#allocation9], 1 }
 0x8f1   :  { %1383 = vsyncpa [#allocation4], 1 }

</bundles_post_ra>
